<compile_context>
chip_gen: v7x
topology: tpu7x:2x2x1
jax: 0.10.0
libtpu: 0.0.40
codegen_flags: <defaults>
</compile_context>

<pallas_src>
import functools

import jax
import jax.numpy as jnp
from jax.experimental import pallas as pl
from jax.experimental.pallas import tpu as pltpu


# ---------------------------------------------------------------------------
# Kernel body
# ---------------------------------------------------------------------------
def _channel_attention_kernel(x_ref, w1_ref, b1_ref, w2_ref, b2_ref, o_ref):
    # x_ref:  (tm, Cp)  lane-dense tile of packed input rows
    # w1_ref: (Cp, Hp)  block-diagonal packed fc1 weight, (in, out) layout
    # b1_ref: (1, Hp)   packed fc1 bias
    # w2_ref: (Hp, Cp)  block-diagonal packed fc2 weight, (in, out) layout
    # b2_ref: (1, Cp)   packed fc2 bias
    # o_ref:  (tm, Cp)  output tile
    xf = x_ref[...].astype(jnp.float32)

    # fc1 + ReLU (MXU, f32 accumulate -- tiny next to the HBM traffic)
    h = jnp.dot(xf, w1_ref[...], preferred_element_type=jnp.float32) + b1_ref[...]
    h = jnp.maximum(h, 0.0)

    # fc2 + sigmoid (exp on the EUP)
    a = jnp.dot(h, w2_ref[...], preferred_element_type=jnp.float32) + b2_ref[...]
    a = jax.nn.sigmoid(a)

    # x * attention + x  ==  x * (attention + 1): single VPU pass, explicit cast
    o_ref[...] = (xf * (a + 1.0)).astype(o_ref.dtype)


# ---------------------------------------------------------------------------
# Helpers
# ---------------------------------------------------------------------------
def _round_up(v, m):
    return ((v + m - 1) // m) * m


def _sublane(dtype) -> int:
    """Sublane granularity for dtype: 8 (f32), 16 (bf16), 32 (int8/fp8)."""
    return max(8, 32 // jnp.dtype(dtype).itemsize)


def _pack_factor(C: int) -> int:
    """How many channel-rows to pack side-by-side so the last dim is 128-dense."""
    if C % 128 == 0:
        return 1
    if C < 128 and 128 % C == 0:
        return 128 // C
    return 1  # fallback: full-array last dim is still a legal block (masked stores)


def _block_repeat(w, pack):
    """(I, O) -> (pack*I, pack*O) block-diagonal repetition of w."""
    if pack == 1:
        return w
    ci, co = w.shape
    out = jnp.zeros((pack * ci, pack * co), dtype=w.dtype)
    for p in range(pack):
        out = out.at[p * ci:(p + 1) * ci, p * co:(p + 1) * co].set(w)
    return out


def _pack_params(w1, b1, w2, b2, pack):
    C, H = w1.shape
    w1p = _block_repeat(w1.astype(jnp.float32), pack)                 # (Cp, Hp)
    w2p = _block_repeat(w2.astype(jnp.float32), pack)                 # (Hp, Cp)
    b1p = jnp.tile(b1.astype(jnp.float32).reshape(1, H), (1, pack))   # (1, Hp)
    b2p = jnp.tile(b2.astype(jnp.float32).reshape(1, C), (1, pack))   # (1, Cp)
    return w1p, b1p, w2p, b2p


# ---------------------------------------------------------------------------
# Forward (jitted; packed params are passed in, not rebuilt per call)
# ---------------------------------------------------------------------------
@functools.partial(jax.jit, static_argnames=("pack", "tm", "donate_x"))
def _channel_attention_fwd(x, w1p, b1p, w2p, b2p, *, pack, tm, donate_x):
    orig_shape = x.shape
    C = orig_shape[-1]
    Cp = pack * C
    Hp = w1p.shape[1]
    itemsize = jnp.dtype(x.dtype).itemsize

    x2d = x.reshape(-1, C)
    M = x2d.shape[0]

    # Pad only to a multiple of `pack` (<= pack-1 rows; none in the common
    # case).  The row tile does NOT require divisibility: the partial last
    # grid block is masked by Pallas, so garbage tail reads only feed tail
    # rows whose stores are dropped (never rely on zeros there).
    M_pad = _round_up(M, pack)
    if M_pad != M:
        x2d = jnp.pad(x2d, ((0, M_pad - M), (0, 0)))
    Mp = M_pad // pack                         # lane-dense packed rows
    x_packed = x2d.reshape(Mp, Cp)

    # Row tile: dtype-aware sublane rounding; clamp to the problem size; keep
    # >= ~4 grid steps when possible (v7x 2-TC megacore + DMA pipelining).
    sub = _sublane(x.dtype)
    tm_eff = min(_round_up(max(tm, sub), sub), _round_up(Mp, sub))
    tm_eff = max(sub, min(tm_eff, _round_up(pl.cdiv(Mp, 4), sub)))
    grid = (pl.cdiv(Mp, tm_eff),)

    H = Hp // pack
    cost = pl.CostEstimate(
        flops=4 * M * C * H + 3 * M * C,
        transcendentals=M * C,
        bytes_accessed=2 * M * C * itemsize
        + (w1p.size + b1p.size + w2p.size + b2p.size) * 4,
    )

    # Scoped VMEM derived from the real working set (double-buffered x in/out
    # + f32 intermediates), only declared when it exceeds the default limits.
    block_bytes = tm_eff * Cp * itemsize
    f32_block = tm_eff * Cp * 4
    vmem_need = 4 * block_bytes + 6 * f32_block + (2 << 20)
    vmem_limit = int(min(vmem_need, 48 * 1024 * 1024)) if vmem_need > (16 << 20) else None

    kwargs = {}
    if donate_x:
        # Output has identical (Mp, Cp)/dtype as x_packed: alias it to avoid a
        # second M*C HBM buffer (pair with jit-level donation for full effect).
        kwargs["input_output_aliases"] = {0: 0}

    out_packed = pl.pallas_call(
        _channel_attention_kernel,
        out_shape=jax.ShapeDtypeStruct((Mp, Cp), x.dtype),
        grid=grid,
        in_specs=[
            pl.BlockSpec((tm_eff, Cp), lambda i: (i, 0)),   # x row tile
            pl.BlockSpec((Cp, Hp), lambda i: (0, 0)),       # w1 packed (whole)
            pl.BlockSpec((1, Hp), lambda i: (0, 0)),        # b1 packed
            pl.BlockSpec((Hp, Cp), lambda i: (0, 0)),       # w2 packed (whole)
            pl.BlockSpec((1, Cp), lambda i: (0, 0)),        # b2 packed
        ],
        out_specs=pl.BlockSpec((tm_eff, Cp), lambda i: (i, 0)),
        compiler_params=pltpu.CompilerParams(
            dimension_semantics=("parallel",),
            vmem_limit_bytes=vmem_limit,
        ),
        cost_estimate=cost,
        **kwargs,
    )(x_packed, w1p, b1p, w2p, b2p)

    out = out_packed.reshape(M_pad, C)
    if M_pad != M:
        out = out[:M]
    return out.reshape(orig_shape)


# ---------------------------------------------------------------------------
# Public API
# ---------------------------------------------------------------------------
def make_channel_attention(w1, b1, w2, b2, *, tm=4096, donate_x=False):
    """Build a ChannelAttention forward fn with packed params hoisted out of
    the per-call path.

    w1: (C, H) fc1 weight in (in, out) layout; b1: (H,)
    w2: (H, C) fc2 weight in (in, out) layout; b2: (C,)
    """
    C, _ = w1.shape
    pack = _pack_factor(C)
    w1p, b1p, w2p, b2p = _pack_params(w1, b1, w2, b2, pack)

    def fwd(x):
        return _channel_attention_fwd(
            x, w1p, b1p, w2p, b2p, pack=pack, tm=tm, donate_x=donate_x)

    return fwd


def channel_attention(x, w1, b1, w2, b2, *, tm=4096, donate_x=False):
    """One-shot convenience wrapper (prefer make_channel_attention for reuse)."""
    return make_channel_attention(w1, b1, w2, b2, tm=tm, donate_x=donate_x)(x)


def _reference(x, w1, b1, w2, b2):
    xf = x.astype(jnp.float32)
    h = jnp.maximum(xf @ w1.astype(jnp.float32) + b1.astype(jnp.float32), 0.0)
    a = jax.nn.sigmoid(h @ w2.astype(jnp.float32) + b2.astype(jnp.float32))
    return xf * a + xf   # kept in f32 for comparisons


if __name__ == "__main__":
    # Shapes consistent with the module: num_channels=64, reduction_ratio=16.
    B, N, C = 2, 8, 64
    H = C // 16  # 4

    key = jax.random.PRNGKey(0)
    kx, kw1, kb1, kw2, kb2, kx2 = jax.random.split(key, 6)

    x = jax.random.normal(kx, (B, N, C), dtype=jnp.float32)
    # PyTorch Linear stores (out, in); weights here are already (in, out).
    w1 = jax.random.normal(kw1, (C, H), dtype=jnp.float32) * 0.1
    b1 = jax.random.normal(kb1, (H,), dtype=jnp.float32) * 0.1
    w2 = jax.random.normal(kw2, (H, C), dtype=jnp.float32) * 0.1
    b2 = jax.random.normal(kb2, (C,), dtype=jnp.float32) * 0.1

    fwd = make_channel_attention(w1, b1, w2, b2)
    out = jax.block_until_ready(fwd(x))
    ref = _reference(x, w1, b1, w2, b2)
    assert out.shape == x.shape and out.dtype == x.dtype
    assert jnp.allclose(out, ref.astype(x.dtype), atol=1e-5, rtol=1e-5), "mismatch vs reference"

    # Odd row count: exercises the <=1-row pack pad, the grid-aware tile clamp
    # and the masked partial last grid block (non-uniform per-channel bias is
    # the pack>1 regression guard).
    x_big = jax.random.normal(kx2, (3, 37, 11, C), dtype=jnp.float32)
    out_big = jax.block_until_ready(make_channel_attention(w1, b1, w2, b2, tm=512)(x_big))
    ref_big = _reference(x_big, w1, b1, w2, b2)
    assert jnp.allclose(out_big, ref_big, atol=1e-5, rtol=1e-5), "mismatch (big) vs reference"

    # bf16 path (16-sublane rounding) with the aliased in-place output variant.
    x_bf16 = jax.random.normal(kx2, (4, 64, C), dtype=jnp.bfloat16)
    out_bf16 = jax.block_until_ready(
        make_channel_attention(w1, b1, w2, b2, donate_x=True)(x_bf16))
    ref_bf16 = _reference(x_bf16, w1, b1, w2, b2)
    assert out_bf16.shape == x_bf16.shape and out_bf16.dtype == jnp.bfloat16
    assert jnp.allclose(out_bf16.astype(jnp.float32), ref_bf16, atol=5e-2, rtol=3e-2), \
        "mismatch (bf16) vs reference"

    print("KERNEL_OK")
</pallas_src>

<mosaic_0001>
module attributes {stable_mosaic.version = 11 : i64} {
  func.func @_channel_attention_kernel(%arg0: i32, %arg1: memref<8x128xf32, #tpu.memory_space<vmem>>, %arg2: memref<128x8xf32, #tpu.memory_space<vmem>>, %arg3: memref<1x8xf32, #tpu.memory_space<vmem>>, %arg4: memref<8x128xf32, #tpu.memory_space<vmem>>, %arg5: memref<1x128xf32, #tpu.memory_space<vmem>>, %arg6: memref<8x128xf32, #tpu.memory_space<vmem>>) attributes {dimension_semantics = [#tpu.dimension_semantics<parallel>], iteration_bounds = array<i64: 1>, scalar_prefetch = 0 : i64, scratch_operands = 0 : i64, tpu.core_type = #tpu.core_type<tc>, window_params = [{transform_indices = @transform_0, window_bounds = array<i64: 8, 128>}, {pipeline_mode = #tpu.pipeline_mode<synchronous>, transform_indices = @transform_1, window_bounds = array<i64: 128, 8>}, {pipeline_mode = #tpu.pipeline_mode<synchronous>, transform_indices = @transform_2, window_bounds = array<i64: 1, 8>}, {pipeline_mode = #tpu.pipeline_mode<synchronous>, transform_indices = @transform_3, window_bounds = array<i64: 8, 128>}, {pipeline_mode = #tpu.pipeline_mode<synchronous>, transform_indices = @transform_4, window_bounds = array<i64: 1, 128>}, {transform_indices = @transform_5, window_bounds = array<i64: 8, 128>}]} {
    %c0 = arith.constant 0 : index
    %c0_0 = arith.constant 0 : index
    %0 = vector.load %arg1[%c0, %c0_0] : memref<8x128xf32, #tpu.memory_space<vmem>>, vector<8x128xf32>
    %c0_1 = arith.constant 0 : index
    %c0_2 = arith.constant 0 : index
    %1 = vector.load %arg2[%c0_1, %c0_2] : memref<128x8xf32, #tpu.memory_space<vmem>>, vector<128x8xf32>
    %cst = arith.constant dense<0.000000e+00> : vector<8x8xf32>
    %2 = tpu.matmul %0, %1, %cst {dimension_numbers = #tpu.dot_dimension_numbers<[1], [0], [0], [1], [0, 0, 1, 1], [], []>} : vector<8x128xf32>, vector<128x8xf32>, vector<8x8xf32> -> vector<8x8xf32>
    %c0_3 = arith.constant 0 : index
    %c0_4 = arith.constant 0 : index
    %3 = vector.load %arg3[%c0_3, %c0_4] : memref<1x8xf32, #tpu.memory_space<vmem>>, vector<1x8xf32>
    %4 = vector.broadcast %3 : vector<1x8xf32> to vector<8x8xf32>
    %5 = arith.addf %2, %4 : vector<8x8xf32>
    %cst_5 = arith.constant 0.000000e+00 : f32
    %6 = vector.broadcast %cst_5 : f32 to vector<8x8xf32>
    %7 = arith.maximumf %5, %6 : vector<8x8xf32>
    %c0_6 = arith.constant 0 : index
    %c0_7 = arith.constant 0 : index
    %8 = vector.load %arg4[%c0_6, %c0_7] : memref<8x128xf32, #tpu.memory_space<vmem>>, vector<8x128xf32>
    %cst_8 = arith.constant dense<0.000000e+00> : vector<8x128xf32>
    %9 = tpu.matmul %7, %8, %cst_8 {dimension_numbers = #tpu.dot_dimension_numbers<[1], [0], [0], [1], [0, 0, 1, 1], [], []>} : vector<8x8xf32>, vector<8x128xf32>, vector<8x128xf32> -> vector<8x128xf32>
    %c0_9 = arith.constant 0 : index
    %c0_10 = arith.constant 0 : index
    %10 = vector.load %arg5[%c0_9, %c0_10] : memref<1x128xf32, #tpu.memory_space<vmem>>, vector<1x128xf32>
    %11 = vector.broadcast %10 : vector<1x128xf32> to vector<8x128xf32>
    %12 = arith.addf %9, %11 : vector<8x128xf32>
    %13 = arith.negf %12 : vector<8x128xf32>
    %14 = math.exp %13 : vector<8x128xf32>
    %cst_11 = arith.constant 1.000000e+00 : f32
    %15 = vector.broadcast %cst_11 : f32 to vector<8x128xf32>
    %16 = arith.addf %15, %14 : vector<8x128xf32>
    %17 = arith.divf %15, %16 : vector<8x128xf32>
    %cst_12 = arith.constant 1.000000e+00 : f32
    %18 = vector.broadcast %cst_12 : f32 to vector<8x128xf32>
    %19 = arith.addf %17, %18 : vector<8x128xf32>
    %20 = arith.mulf %0, %19 : vector<8x128xf32>
    %c0_13 = arith.constant 0 : index
    %c0_14 = arith.constant 0 : index
    %21 = vector.load %arg6[%c0_13, %c0_14] : memref<8x128xf32, #tpu.memory_space<vmem>>, vector<8x128xf32>
    tpu.vector_store %arg6[%c0_13, %c0_14], %20 {strides = array<i32>} : memref<8x128xf32, #tpu.memory_space<vmem>>, vector<8x128xf32>,
    return
  }
  func.func @transform_0(%arg0: i32) -> (i32, i32) {
    %c0_i32 = arith.constant 0 : i32
    %c0_i32_0 = arith.constant 0 : i32
    return %arg0, %c0_i32 : i32, i32
  }
  func.func @transform_1(%arg0: i32) -> (i32, i32) {
    %c0_i32 = arith.constant 0 : i32
    %c0_i32_0 = arith.constant 0 : i32
    %c0_i32_1 = arith.constant 0 : i32
    return %c0_i32, %c0_i32_0 : i32, i32
  }
  func.func @transform_2(%arg0: i32) -> (i32, i32) {
    %c0_i32 = arith.constant 0 : i32
    %c0_i32_0 = arith.constant 0 : i32
    %c0_i32_1 = arith.constant 0 : i32
    return %c0_i32, %c0_i32_0 : i32, i32
  }
  func.func @transform_3(%arg0: i32) -> (i32, i32) {
    %c0_i32 = arith.constant 0 : i32
    %c0_i32_0 = arith.constant 0 : i32
    %c0_i32_1 = arith.constant 0 : i32
    return %c0_i32, %c0_i32_0 : i32, i32
  }
  func.func @transform_4(%arg0: i32) -> (i32, i32) {
    %c0_i32 = arith.constant 0 : i32
    %c0_i32_0 = arith.constant 0 : i32
    %c0_i32_1 = arith.constant 0 : i32
    return %c0_i32, %c0_i32_0 : i32, i32
  }
  func.func @transform_5(%arg0: i32) -> (i32, i32) {
    %c0_i32 = arith.constant 0 : i32
    %c0_i32_0 = arith.constant 0 : i32
    return %arg0, %c0_i32 : i32, i32
  }
}

</mosaic_0001>

<bundles_post_ra>
// kernel: _channel_attention_fwd.1
= control target key start
LH: loop header
LB: loop body
LE: loop exit
PB: predicated region body
PF: predicated region fallthrough
CT: control target
= control target key end

     0   :  { %v304_v0 = vmov 0.0|0.0   ;;  %vm305_vm0 = vmmov 0   ;;  %v306_v4 = vmov 0.0   ;;  %vm123_vm1 = vcmask 64512   ;;  %s400_s1 = inlined_call_operand.vmem [shape: f32[128,8], index: 1, kind: input, shape index: {}]   ;;  %s401_s0 = inlined_call_operand.vmem [shape: f32[8,128], index: 0, kind: input, shape index: {}]   ;;  %s402_s3 = inlined_call_operand.vmem [shape: f32[8,128], index: 3, kind: input, shape index: {}]   ;;  %s403_s2 = inlined_call_operand.vmem [shape: f32[1,8], index: 2, kind: input, shape index: {}]   ;;  %s404_s4 = inlined_call_operand.vmem [shape: f32[1,128], index: 4, kind: input, shape index: {}]   ;;  %s405_s5 = inlined_call_operand.vmem [shape: f32[8,128], index: 5, kind: output, shape index: {}]  }
   0x1   :  { %273 = vmatprep.subr.bf16.mxu0 %v304_v0  ;;  %v21_v1 = vld [vmem:[%s400_s1] sm:$0xff]  ;;  %v22_v2 = vld [vmem:[%s400_s1 + $0x8] sm:$0xff]  ;;  %v23_v3 = vld [vmem:[%s400_s1 + $0x10] sm:$0xff]  ;;  %265 = vmatprep.mubr.msk.f32.mxu0 %vm305_vm0, %v306_v4 }
   0x2   :  { %v274_v5 = vpack.c.bf16 %v22_v2, %v21_v1  ;;  %v24_v6 = vld [vmem:[%s400_s1 + $0x18] sm:$0xff]  ;;  %268 = vmatprep.subr.mxu1 %v306_v4  ;;  %270 = vmatprep.mubr.msk.f32.mxu1 %vm305_vm0, %v306_v4  ;;  %v25_v8 = vld [vmem:[%s400_s1 + $0x20] sm:$0xff]  ;;  %v26_v9 = vld [vmem:[%s400_s1 + $0x28] sm:$0xff] }
   0x3   :  { %v277_v7 = vpack.c.bf16 %v24_v6, %v23_v3  ;;  %v280_v10 = vpack.c.bf16 %v26_v9, %v25_v8  ;;  %v27_v11 = vld [vmem:[%s400_s1 + $0x30] sm:$0xff]  ;;  %v28_v12 = vld [vmem:[%s400_s1 + $0x38] sm:$0xff]  ;;  %v29_v14 = vld [vmem:[%s400_s1 + $0x40] sm:$0xff] }
   0x4   :  { %275 = vmatpush3.bf16.msra.mxu0 %v274_v5  ;;  %v283_v13 = vpack.c.bf16 %v28_v12, %v27_v11  ;;  %v30_v15 = vld [vmem:[%s400_s1 + $0x48] sm:$0xff]  ;;  %v31_v17 = vld [vmem:[%s400_s1 + $0x50] sm:$0xff]  ;;  %v32_v18 = vld [vmem:[%s400_s1 + $0x58] sm:$0xff] }
   0x5   :  { %276 = vmatprep.subr.bf16.mxu0 %v304_v0  ;;  %v286_v16 = vpack.c.bf16 %v30_v15, %v29_v14  ;;  %v289_v19 = vpack.c.bf16 %v32_v18, %v31_v17  ;;  %v33_v20 = vld [vmem:[%s400_s1 + $0x60] sm:$0xff]  ;;  %v34_v21 = vld [vmem:[%s400_s1 + $0x68] sm:$0xff]  ;;  %v35_v23 = vld [vmem:[%s400_s1 + $0x70] sm:$0xff] }
   0x6   :  { %v292_v22 = vpack.c.bf16 %v34_v21, %v33_v20  ;;  %v36_v24 = vld [vmem:[%s400_s1 + $0x78] sm:$0xff]  ;;  %v20_v26 = vld [vmem:[%s401_s0] sm:$0xff] }
   0x7   :  { %v295_v25 = vpack.c.bf16 %v36_v24, %v35_v23  ;;  %v115_v27 = vld [vmem:[%s402_s3] sm:$0xff] }
   0x8   :  { %278 = vmatpush3.bf16.msra.mxu0 %v277_v7  ;;  %269 = vmatpush3.msra.mxu1 %v115_v27  ;;  %v210_v28 = vld [vmem:[%s403_s2] ss:$0 sm:$0xff] }
   0x9   :  { %279 = vmatprep.subr.bf16.mxu0 %v304_v0  ;;  %v211_v33 = vld [vmem:[%s404_s4] ss:$0 sm:$0xff] }
   0xc   :  { %281 = vmatpush3.bf16.msra.mxu0 %v280_v10 }
   0xd   :  { %282 = vmatprep.subr.bf16.mxu0 %v304_v0 }
  0x10   :  { %284 = vmatpush3.bf16.msra.mxu0 %v283_v13 }
  0x11   :  { %285 = vmatprep.subr.bf16.mxu0 %v304_v0 }
  0x14   :  { %287 = vmatpush3.bf16.msra.mxu0 %v286_v16 }
  0x15   :  { %288 = vmatprep.subr.bf16.mxu0 %v304_v0 }
  0x18   :  { %290 = vmatpush3.bf16.msra.mxu0 %v289_v19 }
  0x19   :  { %291 = vmatprep.subr.bf16.mxu0 %v304_v0 }
  0x1c   :  { %293 = vmatpush3.bf16.msra.mxu0 %v292_v22 }
  0x1d   :  { %294 = vmatprep.subr.bf16.mxu0 %v304_v0 }
  0x20   :  { %296 = vmatpush3.bf16.msra.mxu0 %v295_v25 }
  0x23   :  { %266 = vmatmul.mubr.f32.vlgmr.msra.gmra.mrb[0].mxu0 %v20_v26 }
  0xf6   :  { %v110_v29 = vpop.f32.mrb[0].mxu0 }
  0xf7   :  { %v111_v30 = vadd.f32 %v210_v28, %v110_v29  ;;  %v267_v31 = vpop.f32.mrb[1].mxu0 }
  0xf9   :  { %v114_v32 = vmax.f32 %v111_v30, 0.0 }
  0xfb   :  { %271 = vmatmul.mubr.msk.f32.vlgmr.msra.gmra.mrb[0].mxu1 %vm123_vm1, %v114_v32 }
 0x1ce   :  { %v193_v34 = vpop.f32.mrb[0].mxu1 }
 0x1cf   :  { %v194_v35 = vadd.f32 %v211_v33, %v193_v34  ;;  %v272_v36 = vpop.f32.mrb[1].mxu1 }
 0x1d1   :  { %v213_v37 = vmul.f32 -1.442695, %v194_v35 }
 0x1d3   :  { %300 = vpow2.f32 %v213_v37 }
 0x1dd   :  { %v301_v38 = vpop.eup %300 }
 0x1de   :  { %v200_v39 = vadd.f32 1.0, %v301_v38 }
 0x1e0   :  { %302 = vrcp.f32 %v200_v39 }
 0x1ea   :  { %v303_v40 = vpop.eup %302 }
 0x1eb   :  { %v203_v41 = vadd.f32 1.0, %v303_v40 }
 0x1ed   :  { %v204_v42 = vmul.f32 %v203_v41, %v20_v26 }
 0x1ef   :  { %205 = vst [vmem:[%s405_s5] sm:$0xff] %v204_v42 }

</bundles_post_ra>
